<compile_context>
chip_gen: v6e
topology: v6e:2x2x1
jax: 0.10.0
libtpu: 0.0.40
codegen_flags: <defaults>
</compile_context>

<pallas_src>
import functools

import jax
import jax.numpy as jnp
from jax.experimental import pallas as pl
from jax.experimental.pallas import tpu as pltpu

BN_EPS = 1e-5
LANE = 128


def _round_up(x, m):
    return (x + m - 1) // m * m


# --------------------------------------------------------------------------
# Kernel 1: 3x3 / stride-1 / pad-1 conv as a single deep-K matmul per row tile,
# plus per-tile partial BN statistics (sum, sum of squares).
# --------------------------------------------------------------------------
def _conv3x3_kernel(top_ref, mid_ref, bot_ref, w_ref, y_ref, stats_ref):
    # top/mid/bot: (B, W+2, Cp) bf16 rows h-1, h, h+1 of the spatially padded input
    # w_ref      : (9*Cp, Cout_p) bf16, tap-major packed weights
    # y_ref      : (B, W, Cout_p) f32 conv output for image row h
    # stats_ref  : (2, Cout_p) f32 partial [sum; sum of squares] over this tile
    B, W, _ = y_ref.shape
    taps = []
    for r_ref in (top_ref, mid_ref, bot_ref):          # kh = 0, 1, 2
        row = r_ref[...]                                # (B, W+2, Cp)
        for kw in range(3):                             # static kw shifts (VMEM slices)
            taps.append(row[:, kw:kw + W, :].reshape(B * W, -1))
    # Cp is a multiple of 128, so this concat is lane-aligned.
    patches = jnp.concatenate(taps, axis=-1)            # (B*W, 9*Cp) bf16
    acc = jnp.dot(patches, w_ref[...],
                  preferred_element_type=jnp.float32)   # (B*W, Cout_p) f32, one MXU matmul
    y_ref[...] = acc.reshape(y_ref.shape)
    s = jnp.sum(acc, axis=0, keepdims=True)
    ss = jnp.sum(acc * acc, axis=0, keepdims=True)
    stats_ref[...] = jnp.concatenate([s, ss], axis=0)


def _row_spec(B, Wp, C, kh):
    def imap(h):
        return (0, h + kh, 0, 0)
    return pl.BlockSpec((B, None, Wp, C), imap)


def _conv3x3(x_pad_bf16, w_packed, H):
    """x_pad_bf16: (B, H+2, W+2, Cp) bf16; w_packed: (9*Cp, Cout_p) bf16."""
    B, _, Wp, Cin = x_pad_bf16.shape
    W = Wp - 2
    Cout = w_packed.shape[1]
    y, stats = pl.pallas_call(
        _conv3x3_kernel,
        grid=(H,),
        in_specs=[
            _row_spec(B, Wp, Cin, 0),
            _row_spec(B, Wp, Cin, 1),
            _row_spec(B, Wp, Cin, 2),
            pl.BlockSpec((9 * Cin, Cout), lambda h: (0, 0)),  # constant block, fetched once
        ],
        out_specs=(
            pl.BlockSpec((B, None, W, Cout), lambda h: (0, h, 0, 0)),
            pl.BlockSpec((None, 2, Cout), lambda h: (h, 0, 0)),
        ),
        out_shape=(
            jax.ShapeDtypeStruct((B, H, W, Cout), jnp.float32),
            jax.ShapeDtypeStruct((H, 2, Cout), jnp.float32),
        ),
        compiler_params=pltpu.CompilerParams(dimension_semantics=("parallel",)),
    )(x_pad_bf16, x_pad_bf16, x_pad_bf16, w_packed)
    return y, stats


# --------------------------------------------------------------------------
# Kernel 2: per-channel affine (folded BatchNorm) + optional residual + ReLU.
# --------------------------------------------------------------------------
def _bn_act_kernel(y_ref, scale_ref, shift_ref, *rest, apply_relu, has_residual):
    if has_residual:
        res_ref, o_ref = rest
    else:
        (o_ref,) = rest
    v = y_ref[...] * scale_ref[...] + shift_ref[...]     # f32
    if has_residual:
        v = v + res_ref[...]
    if apply_relu:
        v = jnp.maximum(v, 0.0)
    o_ref[...] = v.astype(o_ref.dtype)


def _bn_act(y, scale, shift, residual=None, apply_relu=True, out_dtype=jnp.float32):
    B, H, W, C = y.shape
    tile = pl.BlockSpec((B, None, W, C), lambda h: (0, h, 0, 0))
    par = pl.BlockSpec((1, 1, C), lambda h: (0, 0, 0))
    in_specs = [tile, par, par]
    args = [y, scale, shift]
    if residual is not None:
        in_specs.append(tile)
        args.append(residual)
    kern = functools.partial(_bn_act_kernel, apply_relu=apply_relu,
                             has_residual=residual is not None)
    return pl.pallas_call(
        kern,
        grid=(H,),
        in_specs=in_specs,
        out_specs=tile,
        out_shape=jax.ShapeDtypeStruct((B, H, W, C), out_dtype),
        compiler_params=pltpu.CompilerParams(dimension_semantics=("parallel",)),
    )(*args)


# --------------------------------------------------------------------------
# Glue (tiny, JAX-side): stats reduction -> per-channel scale/shift.
# --------------------------------------------------------------------------
def _finalize_bn(stats, n_rows, gamma_p, beta_p):
    s = jnp.sum(stats[:, 0, :], axis=0)
    ss = jnp.sum(stats[:, 1, :], axis=0)
    mean = s / n_rows
    var = jnp.maximum(ss / n_rows - mean * mean, 0.0)
    scale = gamma_p * jax.lax.rsqrt(var + BN_EPS)
    shift = beta_p - mean * scale
    C = scale.shape[0]
    return scale.reshape(1, 1, C), shift.reshape(1, 1, C)


# --------------------------------------------------------------------------
# BasicBlock forward.
# --------------------------------------------------------------------------
def basic_block_forward(x_nchw, params, use_relu=True):
    B, Cin, H, W = x_nchw.shape
    planes = params["planes"]
    Cp = params["cpad"]

    # NCHW -> NHWC, zero-pad channels to Cp (lane-dense blocks).  (glue)
    x = jnp.transpose(x_nchw, (0, 2, 3, 1)).astype(jnp.float32)
    x_c = jnp.pad(x, ((0, 0), (0, 0), (0, 0), (0, Cp - Cin)))
    n_rows = B * H * W

    def spatial_pad(a):  # 1-pixel zero halo for 3x3/stride-1/pad-1 conv (glue)
        return jnp.pad(a, ((0, 0), (1, 1), (1, 1), (0, 0)))

    # conv1 -> bn1 -> relu
    y1, st1 = _conv3x3(spatial_pad(x_c).astype(jnp.bfloat16), params["w1"], H)
    sc1, sh1 = _finalize_bn(st1, n_rows, params["g1"], params["b1"])
    h = _bn_act(y1, sc1, sh1, residual=None, apply_relu=True, out_dtype=jnp.bfloat16)

    # conv2 -> bn2 -> (+identity residual) -> relu?
    y2, st2 = _conv3x3(spatial_pad(h), params["w2"], H)
    sc2, sh2 = _finalize_bn(st2, n_rows, params["g2"], params["b2"])
    out = _bn_act(y2, sc2, sh2, residual=x_c, apply_relu=use_relu,
                  out_dtype=jnp.float32)

    return jnp.transpose(out[..., :planes], (0, 3, 1, 2))  # -> NCHW


# --------------------------------------------------------------------------
# Parameters (torch-layout weights, plus packed/padded forms for the kernels).
# --------------------------------------------------------------------------
def init_params(key, inplanes, planes):
    k1, k2, k3, k4, k5, k6 = jax.random.split(key, 6)
    # torch conv weight layout: (out_planes, in_planes, 3, 3), bias=False
    w1 = jax.random.normal(k1, (planes, inplanes, 3, 3), jnp.float32) * 0.1
    w2 = jax.random.normal(k2, (planes, planes, 3, 3), jnp.float32) * 0.1
    Cp = _round_up(max(inplanes, planes, LANE), LANE)

    def pack(w_oihw):  # (O, I, 3, 3) -> (9*Cp, Cp) bf16, tap-major rows
        o, i = w_oihw.shape[0], w_oihw.shape[1]
        w = jnp.transpose(w_oihw, (2, 3, 1, 0))                   # (kh, kw, I, O)
        w = jnp.pad(w, ((0, 0), (0, 0), (0, Cp - i), (0, Cp - o)))
        return w.reshape(9 * Cp, Cp).astype(jnp.bfloat16)

    def pad_vec(v, fill):
        return jnp.concatenate(
            [v, jnp.full((Cp - v.shape[0],), fill, jnp.float32)])

    g1 = 1.0 + 0.1 * jax.random.normal(k3, (planes,), jnp.float32)
    b1 = 0.1 * jax.random.normal(k4, (planes,), jnp.float32)
    g2 = 1.0 + 0.1 * jax.random.normal(k5, (planes,), jnp.float32)
    b2 = 0.1 * jax.random.normal(k6, (planes,), jnp.float32)

    return {
        "planes": planes, "cpad": Cp,
        "w1_raw": w1, "w2_raw": w2,
        "w1": pack(w1), "w2": pack(w2),
        "g1": pad_vec(g1, 1.0), "b1": pad_vec(b1, 0.0),
        "g2": pad_vec(g2, 1.0), "b2": pad_vec(b2, 0.0),
    }


# --------------------------------------------------------------------------
# Pure-JAX reference (mirrors the PyTorch forward; conv operands cast to bf16
# to match the kernel's MXU precision choice, accumulation in f32).
# --------------------------------------------------------------------------
def reference_forward(x_nchw, params, use_relu=True):
    x = jnp.transpose(x_nchw, (0, 2, 3, 1)).astype(jnp.float32)
    planes = params["planes"]

    def conv(inp, w_oihw):
        w = jnp.transpose(w_oihw, (2, 3, 1, 0)).astype(jnp.bfloat16)  # HWIO
        return jax.lax.conv_general_dilated(
            inp.astype(jnp.bfloat16), w, (1, 1), "SAME",
            dimension_numbers=("NHWC", "HWIO", "NHWC"),
            preferred_element_type=jnp.float32)

    def bn(inp, g, b):
        g = g[:planes].reshape(1, 1, 1, planes)
        b = b[:planes].reshape(1, 1, 1, planes)
        mean = jnp.mean(inp, axis=(0, 1, 2), keepdims=True)
        var = jnp.mean((inp - mean) ** 2, axis=(0, 1, 2), keepdims=True)
        return (inp - mean) * jax.lax.rsqrt(var + BN_EPS) * g + b

    h = jnp.maximum(bn(conv(x, params["w1_raw"]), params["g1"], params["b1"]), 0.0)
    o = bn(conv(h, params["w2_raw"]), params["g2"], params["b2"]) + x
    if use_relu:
        o = jnp.maximum(o, 0.0)
    return jnp.transpose(o, (0, 3, 1, 2))


if __name__ == "__main__":
    key = jax.random.PRNGKey(0)
    kx, kp = jax.random.split(key)

    B, C, H, W = 2, 4, 16, 16     # inplanes = planes = 4 (toy shapes)
    planes = C
    x = jax.random.normal(kx, (B, C, H, W), jnp.float32)
    params = init_params(kp, C, planes)

    out = jax.block_until_ready(basic_block_forward(x, params, use_relu=True))
    ref = jax.block_until_ready(reference_forward(x, params, use_relu=True))

    assert out.shape == (B, planes, H, W)
    max_err = jnp.max(jnp.abs(out - ref))
    assert jnp.allclose(out, ref, rtol=2e-3, atol=2e-3), f"max abs diff {max_err}"

    print("KERNEL_OK")
</pallas_src>

<mosaic_0001>
module attributes {stable_mosaic.version = 11 : i64} {
  func.func @_conv3x3_kernel(%arg0: i32, %arg1: memref<2x1x18x128xbf16, #tpu.memory_space<vmem>>, %arg2: memref<2x1x18x128xbf16, #tpu.memory_space<vmem>>, %arg3: memref<2x1x18x128xbf16, #tpu.memory_space<vmem>>, %arg4: memref<1152x128xbf16, #tpu.memory_space<vmem>>, %arg5: memref<2x1x16x128xf32, #tpu.memory_space<vmem>>, %arg6: memref<1x2x128xf32, #tpu.memory_space<vmem>>) attributes {dimension_semantics = [#tpu.dimension_semantics<parallel>], iteration_bounds = array<i64: 16>, scalar_prefetch = 0 : i64, scratch_operands = 0 : i64, tpu.core_type = #tpu.core_type<tc>, window_params = [{transform_indices = @transform_0, window_bounds = array<i64: 2, 1, 18, 128>}, {transform_indices = @transform_1, window_bounds = array<i64: 2, 1, 18, 128>}, {transform_indices = @transform_2, window_bounds = array<i64: 2, 1, 18, 128>}, {pipeline_mode = #tpu.pipeline_mode<synchronous>, transform_indices = @transform_3, window_bounds = array<i64: 1152, 128>}, {transform_indices = @transform_4, window_bounds = array<i64: 2, 1, 16, 128>}, {transform_indices = @transform_5, window_bounds = array<i64: 1, 2, 128>}]} {
    %c0 = arith.constant 0 : index
    %c0_0 = arith.constant 0 : index
    %c0_1 = arith.constant 0 : index
    %c0_2 = arith.constant 0 : index
    %0 = vector.load %arg1[%c0, %c0_0, %c0_1, %c0_2] : memref<2x1x18x128xbf16, #tpu.memory_space<vmem>>, vector<2x1x18x128xbf16>
    %1 = vector.shape_cast %0 : vector<2x1x18x128xbf16> to vector<2x18x128xbf16>
    %2 = vector.extract_strided_slice %1 {offsets = [0, 0, 0], sizes = [2, 16, 128], strides = [1, 1, 1]} : vector<2x18x128xbf16> to vector<2x16x128xbf16>
    %3 = vector.shape_cast %2 : vector<2x16x128xbf16> to vector<32x128xbf16>
    %4 = vector.extract_strided_slice %1 {offsets = [0, 1, 0], sizes = [2, 16, 128], strides = [1, 1, 1]} : vector<2x18x128xbf16> to vector<2x16x128xbf16>
    %5 = vector.shape_cast %4 : vector<2x16x128xbf16> to vector<32x128xbf16>
    %6 = vector.extract_strided_slice %1 {offsets = [0, 2, 0], sizes = [2, 16, 128], strides = [1, 1, 1]} : vector<2x18x128xbf16> to vector<2x16x128xbf16>
    %7 = vector.shape_cast %6 : vector<2x16x128xbf16> to vector<32x128xbf16>
    %c0_3 = arith.constant 0 : index
    %c0_4 = arith.constant 0 : index
    %c0_5 = arith.constant 0 : index
    %c0_6 = arith.constant 0 : index
    %8 = vector.load %arg2[%c0_3, %c0_4, %c0_5, %c0_6] : memref<2x1x18x128xbf16, #tpu.memory_space<vmem>>, vector<2x1x18x128xbf16>
    %9 = vector.shape_cast %8 : vector<2x1x18x128xbf16> to vector<2x18x128xbf16>
    %10 = vector.extract_strided_slice %9 {offsets = [0, 0, 0], sizes = [2, 16, 128], strides = [1, 1, 1]} : vector<2x18x128xbf16> to vector<2x16x128xbf16>
    %11 = vector.shape_cast %10 : vector<2x16x128xbf16> to vector<32x128xbf16>
    %12 = vector.extract_strided_slice %9 {offsets = [0, 1, 0], sizes = [2, 16, 128], strides = [1, 1, 1]} : vector<2x18x128xbf16> to vector<2x16x128xbf16>
    %13 = vector.shape_cast %12 : vector<2x16x128xbf16> to vector<32x128xbf16>
    %14 = vector.extract_strided_slice %9 {offsets = [0, 2, 0], sizes = [2, 16, 128], strides = [1, 1, 1]} : vector<2x18x128xbf16> to vector<2x16x128xbf16>
    %15 = vector.shape_cast %14 : vector<2x16x128xbf16> to vector<32x128xbf16>
    %c0_7 = arith.constant 0 : index
    %c0_8 = arith.constant 0 : index
    %c0_9 = arith.constant 0 : index
    %c0_10 = arith.constant 0 : index
    %16 = vector.load %arg3[%c0_7, %c0_8, %c0_9, %c0_10] : memref<2x1x18x128xbf16, #tpu.memory_space<vmem>>, vector<2x1x18x128xbf16>
    %17 = vector.shape_cast %16 : vector<2x1x18x128xbf16> to vector<2x18x128xbf16>
    %18 = vector.extract_strided_slice %17 {offsets = [0, 0, 0], sizes = [2, 16, 128], strides = [1, 1, 1]} : vector<2x18x128xbf16> to vector<2x16x128xbf16>
    %19 = vector.shape_cast %18 : vector<2x16x128xbf16> to vector<32x128xbf16>
    %20 = vector.extract_strided_slice %17 {offsets = [0, 1, 0], sizes = [2, 16, 128], strides = [1, 1, 1]} : vector<2x18x128xbf16> to vector<2x16x128xbf16>
    %21 = vector.shape_cast %20 : vector<2x16x128xbf16> to vector<32x128xbf16>
    %22 = vector.extract_strided_slice %17 {offsets = [0, 2, 0], sizes = [2, 16, 128], strides = [1, 1, 1]} : vector<2x18x128xbf16> to vector<2x16x128xbf16>
    %23 = vector.shape_cast %22 : vector<2x16x128xbf16> to vector<32x128xbf16>
    %24 = tpu.concatenate %3, %5, %7, %11, %13, %15, %19, %21, %23 in 1 : vector<32x128xbf16>, vector<32x128xbf16>, vector<32x128xbf16>, vector<32x128xbf16>, vector<32x128xbf16>, vector<32x128xbf16>, vector<32x128xbf16>, vector<32x128xbf16>, vector<32x128xbf16> -> vector<32x1152xbf16>
    %c0_11 = arith.constant 0 : index
    %c0_12 = arith.constant 0 : index
    %25 = vector.load %arg4[%c0_11, %c0_12] : memref<1152x128xbf16, #tpu.memory_space<vmem>>, vector<1152x128xbf16>
    %cst = arith.constant dense<0.000000e+00> : vector<32x128xf32>
    %26 = tpu.matmul %24, %25, %cst {dimension_numbers = #tpu.dot_dimension_numbers<[1], [0], [0], [1], [0, 0, 1, 1], [], []>} : vector<32x1152xbf16>, vector<1152x128xbf16>, vector<32x128xf32> -> vector<32x128xf32>
    %27 = vector.shape_cast %26 : vector<32x128xf32> to vector<2x16x128xf32>
    %c0_13 = arith.constant 0 : index
    %c0_14 = arith.constant 0 : index
    %c0_15 = arith.constant 0 : index
    %c0_16 = arith.constant 0 : index
    %28 = vector.load %arg5[%c0_13, %c0_14, %c0_15, %c0_16] : memref<2x1x16x128xf32, #tpu.memory_space<vmem>>, vector<2x1x16x128xf32>
    %29 = vector.shape_cast %28 : vector<2x1x16x128xf32> to vector<2x16x128xf32>
    %30 = vector.shape_cast %27 : vector<2x16x128xf32> to vector<2x1x16x128xf32>
    tpu.vector_store %arg5[%c0_13, %c0_14, %c0_15, %c0_16], %30 {strides = array<i32>} : memref<2x1x16x128xf32, #tpu.memory_space<vmem>>, vector<2x1x16x128xf32>,
    %cst_17 = arith.constant dense<0.000000e+00> : vector<128xf32>
    %31 = vector.multi_reduction <add>, %26, %cst_17 [0] : vector<32x128xf32> to vector<128xf32>
    %32 = vector.shape_cast %31 : vector<128xf32> to vector<1x128xf32>
    %33 = arith.mulf %26, %26 : vector<32x128xf32>
    %cst_18 = arith.constant dense<0.000000e+00> : vector<128xf32>
    %34 = vector.multi_reduction <add>, %33, %cst_18 [0] : vector<32x128xf32> to vector<128xf32>
    %35 = vector.shape_cast %34 : vector<128xf32> to vector<1x128xf32>
    %36 = tpu.concatenate %32, %35 in 0 : vector<1x128xf32>, vector<1x128xf32> -> vector<2x128xf32>
    %c0_19 = arith.constant 0 : index
    %c0_20 = arith.constant 0 : index
    %c0_21 = arith.constant 0 : index
    %37 = vector.load %arg6[%c0_19, %c0_20, %c0_21] : memref<1x2x128xf32, #tpu.memory_space<vmem>>, vector<1x2x128xf32>
    %38 = vector.shape_cast %37 : vector<1x2x128xf32> to vector<2x128xf32>
    %39 = vector.shape_cast %36 : vector<2x128xf32> to vector<1x2x128xf32>
    tpu.vector_store %arg6[%c0_19, %c0_20, %c0_21], %39 {strides = array<i32>} : memref<1x2x128xf32, #tpu.memory_space<vmem>>, vector<1x2x128xf32>,
    return
  }
  func.func @transform_0(%arg0: i32) -> (i32, i32, i32, i32) {
    %c0_i32 = arith.constant 0 : i32
    %0 = arith.addi %arg0, %c0_i32 : i32
    %c0_i32_0 = arith.constant 0 : i32
    %c0_i32_1 = arith.constant 0 : i32
    %c0_i32_2 = arith.constant 0 : i32
    %c0_i32_3 = arith.constant 0 : i32
    return %c0_i32_0, %0, %c0_i32_1, %c0_i32_2 : i32, i32, i32, i32
  }
  func.func @transform_1(%arg0: i32) -> (i32, i32, i32, i32) {
    %c1_i32 = arith.constant 1 : i32
    %0 = arith.addi %arg0, %c1_i32 : i32
    %c0_i32 = arith.constant 0 : i32
    %c0_i32_0 = arith.constant 0 : i32
    %c0_i32_1 = arith.constant 0 : i32
    %c0_i32_2 = arith.constant 0 : i32
    return %c0_i32, %0, %c0_i32_0, %c0_i32_1 : i32, i32, i32, i32
  }
  func.func @transform_2(%arg0: i32) -> (i32, i32, i32, i32) {
    %c2_i32 = arith.constant 2 : i32
    %0 = arith.addi %arg0, %c2_i32 : i32
    %c0_i32 = arith.constant 0 : i32
    %c0_i32_0 = arith.constant 0 : i32
    %c0_i32_1 = arith.constant 0 : i32
    %c0_i32_2 = arith.constant 0 : i32
    return %c0_i32, %0, %c0_i32_0, %c0_i32_1 : i32, i32, i32, i32
  }
  func.func @transform_3(%arg0: i32) -> (i32, i32) {
    %c0_i32 = arith.constant 0 : i32
    %c0_i32_0 = arith.constant 0 : i32
    %c0_i32_1 = arith.constant 0 : i32
    return %c0_i32, %c0_i32_0 : i32, i32
  }
  func.func @transform_4(%arg0: i32) -> (i32, i32, i32, i32) {
    %c0_i32 = arith.constant 0 : i32
    %c0_i32_0 = arith.constant 0 : i32
    %c0_i32_1 = arith.constant 0 : i32
    %c0_i32_2 = arith.constant 0 : i32
    return %c0_i32, %arg0, %c0_i32_0, %c0_i32_1 : i32, i32, i32, i32
  }
  func.func @transform_5(%arg0: i32) -> (i32, i32, i32) {
    %c0_i32 = arith.constant 0 : i32
    %c0_i32_0 = arith.constant 0 : i32
    %c0_i32_1 = arith.constant 0 : i32
    return %arg0, %c0_i32, %c0_i32_0 : i32, i32, i32
  }
}

</mosaic_0001>

<bundles_post_ra>
// kernel: tpu_custom_call.1
= control target key start
LH: loop header
LB: loop body
LE: loop exit
PB: predicated region body
PF: predicated region fallthrough
CT: control target
= control target key end

     0   :  { %s2990_s0 = inlined_call_operand.vmem [shape: bf16[2,18,18,128], index: 0, kind: input, shape index: {}]   ;;  %s2991_s1 = inlined_call_operand.vmem [shape: bf16[2,18,18,128], index: 1, kind: input, shape index: {}]   ;;  %s2992_s2 = inlined_call_operand.vmem [shape: bf16[2,18,18,128], index: 2, kind: input, shape index: {}]   ;;  %s2993_s3 = inlined_call_operand.vmem [shape: bf16[1152,128], index: 3, kind: input, shape index: {}]   ;;  %s2994_s4 = inlined_call_operand.hbm [shape: f32[2,16,16,128], index: 4, kind: output, shape index: {0}]   ;;  %s2995_s5 = inlined_call_operand.hbm [shape: f32[16,2,128], index: 5, kind: output, shape index: {1}]  }
   0x1   :  { %2996 = sst [smem:[#allocation14_spill]] %s2990_s0 }
   0x2   :  { %2997 = sst [smem:[#allocation15_spill]] %s2991_s1 }
   0x3   :  { %2998 = sst [smem:[#allocation16_spill]] %s2992_s2 }
   0x4   :  { %11 = vsyncpa [#allocation6], 0 }
   0x5   :  { %13 = vsyncpa [#allocation6 + $0x1], 0 }
   0x6   :  { %14 = vsyncpa [#allocation8], 0 }
   0x7   :  { %16 = vsyncpa [#allocation8 + $0x1], 0  ;;  %s2393_s18 = smov 0   ;;  %s2395_s19 = smov 0  }
   0x8   :  { %s2397_s20 = smov 0   ;;  %s2399_s21 = smov 0  }
   0x9   :  { %s2401_s22 = smov 0   ;;  %s2403_s23 = smov 0  }
   0xa   :  { %s2405_s24 = smov 0   ;;  %s2407_s25 = smov 0  }
   0xb LB: > { %s2434_s26 = sadd.s32 4294967295, %s2353_s25   ;;  %s1818_s27 = sadd.s32 4294967294, %s2353_s25   ;;  %s2353_s25 = sphi %s2407_s25, %s3021_s25   ;;  %s2349_s24 = sphi %s2405_s24, %s3020_s24   ;;  %s2345_s23 = sphi %s2403_s23, %s3019_s23   ;;  %s2341_s22 = sphi %s2401_s22, %s3018_s22   ;;  %s2337_s21 = sphi %s2399_s21, %s3017_s21   ;;  %s2333_s20 = sphi %s2397_s20, %s3016_s20   ;;  %s2329_s19 = sphi %s2395_s19, %s3015_s19   ;;  %s2325_s18 = sphi %s2393_s18, %s3014_s18  }
   0xc   : > { %s2438_s28 = sadd.s32 1, %s2353_s25   ;;  %s29_s29 = sadd.s32 1, %s2349_s24 }
   0xd   : > { %s26_s30 = ssub.s32 %s2353_s25, %s2438_s28  ;;  %p36_p0 = scmp.ne.s32.totalorder %s2349_s24, %s2345_s23 }
   0xe   : > { %p27_p1 = scmp.eq.s32.totalorder %s26_s30, 0  ;;  %p37_p2 = scmp.eq.s32.totalorder %s2353_s25, 0 }
   0xf   : > { %s53_s6 = sadd.s32 1, %s2438_s28  ;;  %s57_s7 = sadd.s32 1, %s2341_s22 }
  0x10   : > { %s2449_s8 = scalar_select %p27_p1, %s2349_s24, %s29_s29  }
  0x11   : > { %p2456_p3 = por %p37_p2, %p36_p0  ;;  %s54_s10 = ssub.s32 %s2438_s28, %s53_s6 }
  0x12   : > { %2999 = sst [smem:[#allocation13_spill]] %s2449_s8  ;;  %p55_p4 = scmp.eq.s32.totalorder %s54_s10, 0 }
  0x13   : > { %p64_p5 = scmp.ne.s32.totalorder %s2341_s22, %s2337_s21  ;;  %s80_s11 = sadd.s32 2, %s2353_s25 }
  0x14   : > { %s81_s12 = sadd.s32 2, %s2438_s28  ;;  %s85_s16 = sadd.s32 1, %s2333_s20 }
  0x15   : > { %s2466_s13 = scalar_select %p55_p4, %s2341_s22, %s57_s7  }
  0x16   : > { %p2470_p6 = por %p64_p5, %p37_p2  ;;  %s82_s15 = ssub.s32 %s80_s11, %s81_s12 }
  0x17   : > { %p83_p7 = scmp.eq.s32.totalorder %s82_s15, 0  ;;  %p92_p8 = scmp.ne.s32.totalorder %s2333_s20, %s2329_s19 }
  0x18   : > { %p143_p9 = scmp.eq.s32.totalorder %s2434_s26, 15  ;;  %p148_p12 = scmp.ne.s32.totalorder %s2345_s23, %s2325_s18 }
  0x19   : > { %s2479_s17 = scalar_select %p83_p7, %s2333_s20, %s85_s16  }
  0x1a   : > { %p2483_p10 = por %p92_p8, %p37_p2  ;;  %p2490_p11 = por %p143_p9, %p36_p0 }
  0x1b   : > { %p149_p13 = scmp.eq.s32.totalorder %s1818_s27, 15  ;;  %p1820_p4 = scmp.ge.s32.totalorder %s2353_s25, 16 }
  0x1d   : > { %p2496_p1 = por %p149_p13, %p148_p12  ;;  %194 = sbr.rel (%p1820_p4) target bundleno = 67 (0x43), region = 20 }
  0x22   : > { %197 = sbr.rel (!%p2456_p3) target bundleno = 45 (0x2d), region = 24  ;;  %s199_s7 = sand.u32 (%p2456_p3), 1, %s2349_s24  }
  0x23   : > { %s2084_s10 = smul.u32 (%p2456_p3), 12, %s2353_s25  ;;  %s3005_s0 = sld [smem:[#allocation14_spill]] (%p2456_p3) }
  0x24   : > { %s2083_s11 = smul.u32 (%p2456_p3), 24, %s199_s7 }
  0x26   : > { %s201_s27 = scalar_lea.vmem (%p2456_p3), [#allocation2], %s2083_s11 }
  0x29   : > { %s204_s16 = scalar_lea.vmem %s3005_s0, %s2084_s10 }
  0x2a   : > { %v221_v0 = vld [vmem:[%s204_s16] sm:$0xff]   ;;  %v225_v1 = vld [vmem:[%s204_s16 + $0x8] sm:$0xf]  ;;  %v227_v2 = vld [vmem:[%s204_s16 + $0xd8] sm:$0xff]  }
  0x2b   : > { %222 = vst [vmem:[%s201_s27] sm:$0xff] %v221_v0   ;;  %226 = vst [vmem:[%s201_s27 + $0x8] sm:$0xf] %v225_v1  ;;  %v231_v3 = vld [vmem:[%s204_s16 + $0xe0] sm:$0xf] }
  0x2c   : > { %228 = vst [vmem:[%s201_s27 + $0xc] sm:$0xff] %v227_v2   ;;  %232 = vst [vmem:[%s201_s27 + $0x14] sm:$0xf] %v231_v3 }
  0x2d PF: > { %268 = sbr.rel (!%p2470_p6) target bundleno = 56 (0x38), region = 65  ;;  %s270_s9 = sand.u32 (%p2470_p6), 1, %s2341_s22  }
  0x2e   : > { %s1722_s7 = smul.u32 (%p2470_p6), 12, %s2353_s25  ;;  %s3006_s1 = sld [smem:[#allocation15_spill]] (%p2470_p6) }
  0x2f   : > { %s2085_s8 = smul.u32 (%p2470_p6), 24, %s270_s9 }
  0x31   : > { %s272_s11 = scalar_lea.vmem (%p2470_p6), [#allocation3], %s2085_s8 }
  0x34   : > { %s1723_s15 = scalar_lea.vmem %s3006_s1, %s1722_s7 }
  0x35   : > { %v1822_v4 = vld [vmem:[%s1723_s15 + $0xc] sm:$0xff]   ;;  %v1824_v5 = vld [vmem:[%s1723_s15 + $0x14] sm:$0xf]  ;;  %v1825_v6 = vld [vmem:[%s1723_s15 + $0xe4] sm:$0xff]  }
  0x36   : > { %294 = vst [vmem:[%s272_s11] sm:$0xff] %v1822_v4   ;;  %298 = vst [vmem:[%s272_s11 + $0x8] sm:$0xf] %v1824_v5  ;;  %v1827_v7 = vld [vmem:[%s1723_s15 + $0xec] sm:$0xf] }
  0x37   : > { %300 = vst [vmem:[%s272_s11 + $0xc] sm:$0xff] %v1825_v6   ;;  %304 = vst [vmem:[%s272_s11 + $0x14] sm:$0xf] %v1827_v7 }
  0x38 PF: > { %340 = sbr.rel (!%p2483_p10) target bundleno = 67 (0x43), region = 106  ;;  %s342_s14 = sand.u32 (%p2483_p10), 1, %s2333_s20  }
  0x39   : > { %s1727_s16 = smul.u32 (%p2483_p10), 12, %s2353_s25  ;;  %s3007_s2 = sld [smem:[#allocation16_spill]] (%p2483_p10) }
  0x3a   : > { %s2086_s27 = smul.u32 (%p2483_p10), 24, %s342_s14 }
  0x3c   : > { %s344_s8 = scalar_lea.vmem (%p2483_p10), [#allocation4], %s2086_s27 }
  0x3f   : > { %s1728_s12 = scalar_lea.vmem %s3007_s2, %s1727_s16 }
  0x40   : > { %v1828_v8 = vld [vmem:[%s1728_s12 + $0x18] sm:$0xff]   ;;  %v1830_v9 = vld [vmem:[%s1728_s12 + $0x20] sm:$0xf]  ;;  %v1831_v10 = vld [vmem:[%s1728_s12 + $0xf0] sm:$0xff]  }
  0x41   : > { %366 = vst [vmem:[%s344_s8] sm:$0xff] %v1828_v8   ;;  %370 = vst [vmem:[%s344_s8 + $0x8] sm:$0xf] %v1830_v9  ;;  %v1833_v11 = vld [vmem:[%s1728_s12 + $0xf8] sm:$0xf] }
  0x42   : > { %372 = vst [vmem:[%s344_s8 + $0xc] sm:$0xff] %v1831_v10   ;;  %376 = vst [vmem:[%s344_s8 + $0x14] sm:$0xf] %v1833_v11 }
  0x43 PF: > { %p1834_p0 = scmp.ge.s32.totalorder %s2353_s25, 1  ;;  %p411_p2 = scmp.lt.s32.totalorder %s2353_s25, 17 }
  0x45   : > { %p412_p3 = pnand %p1834_p0, %p411_p2 }
  0x46   : > { %s2531_s14 = sand.u32 (!%p412_p3), 1, %s2345_s23   ;;  %s425_s29 = sand.u32 (!%p412_p3), 1, %s2337_s21  }
  0x47   : > { %415 = sbr.rel (%p412_p3) target bundleno = 430 (0x1ae), region = 147  ;;  %s432_s7 = sand.u32 (!%p412_p3), 1, %s2329_s19  }
  0x48   : > { %s2087_s11 = smul.u32 (!%p412_p3), 24, %s2531_s14  ;;  %s1835_s10 = sshll.u32 (!%p412_p3), %s2531_s14, 5 }
  0x49   : > { %s2088_s0 = smul.u32 (!%p412_p3), 24, %s425_s29  ;;  %s1836_s15 = sshll.u32 (!%p412_p3), %s2531_s14, 1 }
  0x4a   : > { %s2625_s29 = scalar_lea.vmem (!%p412_p3), [#allocation2], %s2087_s11  ;;  %s471_s16 = scalar_lea.vmem (!%p412_p3), [#allocation7], %s1836_s15 }
  0x4b   : > { %s2631_s11 = scalar_lea.vmem (!%p412_p3), [#allocation3], %s2088_s0  ;;  %s2648_s0 = smul.u32 (!%p412_p3), 24, %s432_s7 }
  0x4c   : > { %v2179_v12 = vld [vmem:[%s2993_s3 + $0x78] sm:$0xff]   ;;  %v2183_v16 = vld [vmem:[%s2993_s3 + $0x70] sm:$0xff]   ;;  %v2187_v20 = vld [vmem:[%s2993_s3 + $0x68] sm:$0xff]   ;;  %vm538_vm0 = vcmask 1042432   ;;  %vm539_vm1 = vcmask 1046532   ;;  %vm1622_vm6 = vcmask 1040384  }
  0x4d   : > { %v2180_v13 = vld [vmem:[%s2993_s3 + $0xf8] sm:$0xff]   ;;  %1941 = vmatprep.subr.bf16.mxu0 %v2179_v12  ;;  %v2184_v17 = vld [vmem:[%s2993_s3 + $0xf0] sm:$0xff]   ;;  %v2188_v21 = vld [vmem:[%s2993_s3 + $0xe8] sm:$0xff]   ;;  %vm481_vm2 = vsmask.f32 3328  ;;  %s2819_s8 = scalar_lea.vmem [#allocation4], %s2648_s0 }
  0x4e   : > { %v2181_v14 = vld [vmem:[%s2993_s3 + $0x38] sm:$0xff]   ;;  %1969 = vmatprep.subr.bf16.mxu1 %v2180_v13  ;;  %v2185_v18 = vld [vmem:[%s2993_s3 + $0x30] sm:$0xff]   ;;  %v2189_v22 = vld [vmem:[%s2993_s3 + $0x28] sm:$0xff]   ;;  %vm482_vm3 = vsmask.f32 7440  ;;  %s1626_s27 = scalar_lea.sflag [#allocation6], %s2531_s14 }
  0x4f   : > { %v2182_v15 = vld [vmem:[%s2993_s3 + $0xb8] sm:$0xff]   ;;  %1942 = vmatpush3.bf16.msra.mxu0 %v2181_v14  ;;  %v2186_v19 = vld [vmem:[%s2993_s3 + $0xb0] sm:$0xff]   ;;  %v2190_v23 = vld [vmem:[%s2993_s3 + $0xa8] sm:$0xff]  }
  0x50   : > { %1970 = vmatpush3.bf16.msra.mxu1 %v2182_v15  ;;  %1943 = vmatprep.subr.bf16.mxu0 %v2183_v16  ;;  %v2191_v24 = vld [vmem:[%s2993_s3 + $0x60] sm:$0xff]   ;;  %v2195_v28 = vld [vmem:[%s2993_s3 + $0x58] sm:$0xff]   ;;  %v2199_v32 = vld [vmem:[%s2993_s3 + $0x50] sm:$0xff]  }
  0x51   : > { %1971 = vmatprep.subr.bf16.mxu1 %v2184_v17  ;;  %v2192_v25 = vld [vmem:[%s2993_s3 + $0xe0] sm:$0xff]   ;;  %v2196_v29 = vld [vmem:[%s2993_s3 + $0xd8] sm:$0xff]   ;;  %v2200_v33 = vld [vmem:[%s2993_s3 + $0xd0] sm:$0xff]  }
  0x52   : > { %v2193_v26 = vld [vmem:[%s2993_s3 + $0x20] sm:$0xff]   ;;  %v2197_v30 = vld [vmem:[%s2993_s3 + $0x18] sm:$0xff]   ;;  %v2201_v34 = vld [vmem:[%s2993_s3 + $0x10] sm:$0xff]  }
  0x53   : > { %1944 = vmatpush3.bf16.msra.mxu0 %v2185_v18  ;;  %v2194_v27 = vld [vmem:[%s2993_s3 + $0xa0] sm:$0xff]   ;;  %v2198_v31 = vld [vmem:[%s2993_s3 + $0x98] sm:$0xff]   ;;  %v2202_v35 = vld [vmem:[%s2993_s3 + $0x90] sm:$0xff]  }
  0x54   : > { %1972 = vmatpush3.bf16.msra.mxu1 %v2186_v19  ;;  %1945 = vmatprep.subr.bf16.mxu0 %v2187_v20  ;;  %v2203_v36 = vld [vmem:[%s2993_s3 + $0x48] sm:$0xff]   ;;  %v2207_v40 = vld [vmem:[%s2993_s3 + $0x40] sm:$0xff]   ;;  %v2213_v59 = vld [vmem:[%s2993_s3 + $0x178] sm:$0xff]  }
  0x55   : > { %1973 = vmatprep.subr.bf16.mxu1 %v2188_v21  ;;  %v2204_v37 = vld [vmem:[%s2993_s3 + $0xc8] sm:$0xff]   ;;  %v2208_v41 = vld [vmem:[%s2993_s3 + $0xc0] sm:$0xff]   ;;  %vm2643_vm4 = vmor %vm481_vm2, %vm482_vm3 }
  0x56   : > { %v2205_v38 = vld [vmem:[%s2993_s3 + $0x8] sm:$0xff]   ;;  %v2209_v42 = vld [vmem:[%s2993_s3] sm:$0xff]   ;;  %vm2655_vm5 = vmor %vm538_vm0, %vm539_vm1 }
  0x57   : > { %1946 = vmatpush3.bf16.msra.mxu0 %v2189_v22  ;;  %v2206_v39 = vld [vmem:[%s2993_s3 + $0x88] sm:$0xff]   ;;  %v2210_v43 = vld [vmem:[%s2993_s3 + $0x80] sm:$0xff]   ;;  %v2215_v8 = vld [vmem:[%s2993_s3 + $0x1f8] sm:$0xff]  }
  0x58   : > { %1974 = vmatpush3.bf16.msra.mxu1 %v2190_v23  ;;  %1947 = vmatprep.subr.bf16.mxu0 %v2191_v24  ;;  %v475_v44 = vld [vmem:[%s2625_s29] sm:$0xf]  ;;  %v476_v45 = vld [vmem:[%s2625_s29 + $0x4] sm:$0xf]  ;;  %v477_v46 = vld [vmem:[%s2625_s29 + $0x8] sm:$0x1] }
  0x59   : > { %1975 = vmatprep.subr.bf16.mxu1 %v2192_v25  ;;  %v485_v47 = vshrl.u32 %v475_v44, 16  ;;  %v488_v48 = vshll.u32 %v475_v44, 16  ;;  %v494_v49 = vshll.u32 %v476_v45, 16  ;;  %v498_v50 = vshrl.u32 %v476_v45, 16  ;;  %v2634_v54 = vld [vmem:[%s2631_s11] sm:$0xf] }
  0x5a   : > { %v504_v51 = vshll.u32 %v477_v46, 16  ;;  %v2637_v57 = vld [vmem:[%s2631_s11 + $0x4] sm:$0xf]  ;;  %v546_v63 = vrot.slane %v477_v46, 5  ;;  %v562_v0 = vshrl.u32 %v2634_v54, 16  ;;  %v565_v2 = vshll.u32 %v2634_v54, 16 }
  0x5b   : > { %1948 = vmatpush3.bf16.msra.mxu0 %v2193_v26  ;;  %v487_v52 = vrot.slane %v485_v47, 4  ;;  %v490_v53 = vrot.slane %v488_v48, 5  ;;  %v496_v55 = vrot.slane %v494_v49, 5  ;;  %v500_v56 = vrot.slane %v498_v50, 4  ;;  %v2214_v16 = vld [vmem:[%s2993_s3 + $0x138] sm:$0xff]   ;;  %v2217_v22 = vld [vmem:[%s2993_s3 + $0x170] sm:$0xff]  }
  0x5c   : > { %1976 = vmatpush3.bf16.msra.mxu1 %v2194_v27  ;;  %1949 = vmatprep.subr.bf16.mxu0 %v2195_v28  ;;  %v506_v62 = vrot.slane %v504_v51, 5  ;;  %v1849_v3 = vcombine.low %v2634_v54, %v2637_v57  ;;  %v1837_v6 = vrot.slane %v475_v44, 9  ;;  %v543_v7 = vrot.slane %v476_v45, 5  ;;  %v2216_v19 = vld [vmem:[%s2993_s3 + $0x1b8] sm:$0xff]   ;;  %v2219_v25 = vld [vmem:[%s2993_s3 + $0x1f0] sm:$0xff]  }
  0x5d   : > { %1977 = vmatprep.subr.bf16.mxu1 %v2196_v29  ;;  %v491_v58 = vor.u32 %v490_v53, %v487_v52  ;;  %v501_v61 = vor.u32 %v500_v56, %v496_v55  ;;  %v571_v10 = vshll.u32 %v2637_v57, 16  ;;  %v575_v11 = vshrl.u32 %v2637_v57, 16  ;;  %v2218_v27 = vld [vmem:[%s2993_s3 + $0x130] sm:$0xff]   ;;  %v2221_v29 = vld [vmem:[%s2993_s3 + $0x168] sm:$0xff]   ;;  %v2230_v53 = vld [vmem:[%s2993_s3 + $0x118] sm:$0xff]  }
  0x5e   : > { %1432 = vmatprep.mubr.bf16.mxu1 %v1849_v3  ;;  %v1843_v13 = vcombine.low %v475_v44, %v476_v45  ;;  %v544_v14 = vsel %vm2655_vm5, %v1837_v6, %v543_v7  ;;  %v545_v15 = vrot.slane %v543_v7, 4  ;;  %v564_v18 = vrot.slane %v562_v0, 4  ;;  %v2220_v28 = vld [vmem:[%s2993_s3 + $0x1b0] sm:$0xff]   ;;  %v478_v45 = vld [vmem:[%s2625_s29 + $0xc] sm:$0xf]  ;;  %v2234_v6 = vld [vmem:[%s2993_s3 + $0x198] sm:$0xff]  }
  0x5f   : > { %1950 = vmatpush3.bf16.msra.mxu0 %v2197_v30  ;;  %v492_v1 = vrot.slane %v491_v58, 4  ;;  %v502_v5 = vrot.slane %v501_v61, 4  ;;  %v567_v20 = vrot.slane %v565_v2, 5  ;;  %v2681_v23 = vrot.slane %v571_v10, 5  ;;  %v479_v46 = vld [vmem:[%s2625_s29 + $0x10] sm:$0xf] }
  0x60   : > { %1978 = vmatpush3.bf16.msra.mxu1 %v2198_v31  ;;  %1951 = vmatprep.subr.bf16.mxu0 %v2199_v32  ;;  %v547_v21 = vsel %vm2655_vm5, %v545_v15, %v546_v63  ;;  %v577_v26 = vrot.slane %v575_v11, 4  ;;  %v2223_v31 = vld [vmem:[%s2993_s3 + $0x1e8] sm:$0xff]   ;;  %v509_v48 = vshrl.u32 %v478_v45, 16  ;;  %v512_v49 = vshll.u32 %v478_v45, 16  ;;  %v2734_v52 = vld [vmem:[%s2631_s11 + $0xc] sm:$0xf] }
  0x61   : > { %1979 = vmatprep.subr.bf16.mxu1 %v2200_v33  ;;  %v497_v9 = vsel %vm2643_vm4, %v492_v1, %v496_v55  ;;  %v507_v12 = vsel %vm2643_vm4, %v502_v5, %v506_v62  ;;  %v1847_v24 = vcombine.low %v544_v14, %v547_v21  ;;  %v568_v30 = vor.u32 %v567_v20, %v564_v18  ;;  %v2222_v33 = vld [vmem:[%s2993_s3 + $0x128] sm:$0xff]   ;;  %v2740_v56 = vld [vmem:[%s2631_s11 + $0x10] sm:$0xf] }
  0x62   : > { %v1845_v17 = vcombine.low %v497_v9, %v507_v12  ;;  %v578_v32 = vor.u32 %v577_v26, %v2681_v23  ;;  %v480_v47 = vld [vmem:[%s2625_s29 + $0x14] sm:$0x1]  ;;  %v518_v50 = vshll.u32 %v479_v46, 16  ;;  %v522_v51 = vshrl.u32 %v479_v46, 16 }
  0x63   : > { %1952 = vmatpush3.bf16.msra.mxu0 %v2201_v34  ;;  %v617_v34 = vrot.slane %v2637_v57, 5  ;;  %v528_v55 = vshll.u32 %v480_v47, 16  ;;  %v586_v58 = vshrl.u32 %v2734_v52, 16  ;;  %v511_v61 = vrot.slane %v509_v48, 4  ;;  %v2235_v12 = vld [vmem:[%s2993_s3 + $0x150] sm:$0xff]  }
  0x64   : > { %1980 = vmatpush3.bf16.msra.mxu1 %v2202_v35  ;;  %1953 = vmatprep.subr.bf16.mxu0 %v2203_v36  ;;  %v2224_v35 = vld [vmem:[%s2993_s3 + $0x1a8] sm:$0xff]   ;;  %v1839_v36 = vrot.slane %v2634_v54, 9  ;;  %v514_v62 = vrot.slane %v512_v49, 5  ;;  %v520_v63 = vrot.slane %v518_v50, 5  ;;  %v524_v0 = vrot.slane %v522_v51, 4 }
  0x65   : > { %1981 = vmatprep.subr.bf16.mxu1 %v2204_v37  ;;  %1383 = vmatprep.mubr.bf16.mxu0 %v1845_v17  ;;  %v2225_v37 = vld [vmem:[%s2993_s3 + $0x160] sm:$0xff]   ;;  %v2728_v44 = vrot.slane %v617_v34, 4  ;;  %v530_v1 = vrot.slane %v528_v55, 5  ;;  %v589_v2 = vshll.u32 %v2734_v52, 16  ;;  %v1850_v3 = vcombine.low %v2734_v52, %v2740_v56  ;;  %v2236_v17 = vld [vmem:[%s2993_s3 + $0x110] sm:$0xff]   ;;  %v2247_v55 = vld [vmem:[%s2993_s3 + $0x238] sm:$0xff]  }
  0x66   : > { %v1838_v5 = vrot.slane %v478_v45, 9  ;;  %v515_v7 = vor.u32 %v514_v62, %v511_v61  ;;  %v550_v9 = vrot.slane %v479_v46, 5  ;;  %v553_v10 = vrot.slane %v480_v47, 5  ;;  %v2245_v47 = vld [vmem:[%s2993_s3 + $0x1c0] sm:$0xff]   ;;  %v557_v48 = vld [vmem:[%s2631_s11 + $0x8] sm:$0x1] }
  0x67   : > { %1954 = vmatpush3.bf16.msra.mxu0 %v2205_v38  ;;  %v2710_v38 = vrot.slane %v568_v30, 4  ;;  %v599_v11 = vshrl.u32 %v2740_v56, 16  ;;  %v1844_v18 = vcombine.low %v478_v45, %v479_v46  ;;  %v1840_v30 = vrot.slane %v2734_v52, 9  ;;  %v2244_v45 = vld [vmem:[%s2993_s3 + $0x100] sm:$0xff]  }
  0x68   : > { %1982 = vmatpush3.bf16.msra.mxu1 %v2206_v39  ;;  %1955 = vmatprep.subr.bf16.mxu0 %v2207_v40  ;;  %v2226_v39 = vld [vmem:[%s2993_s3 + $0x120] sm:$0xff]   ;;  %v551_v15 = vsel %vm2655_vm5, %v1838_v5, %v550_v9  ;;  %v581_v50 = vshll.u32 %v557_v48, 16  ;;  %v618_v51 = vsel %vm2655_vm5, %v1839_v36, %v617_v34  ;;  %v620_v52 = vrot.slane %v557_v48, 5 }
  0x69   : > { %1983 = vmatprep.subr.bf16.mxu1 %v2208_v41  ;;  %v2227_v40 = vld [vmem:[%s2993_s3 + $0x1e0] sm:$0xff]   ;;  %v2718_v41 = vrot.slane %v578_v32, 4  ;;  %v591_v32 = vrot.slane %v589_v2, 5  ;;  %v574_v57 = vsel %vm2643_vm4, %v2710_v38, %v2681_v23 }
  0x6a   : > { %v2822_v54 = vld [vmem:[%s2819_s8] sm:$0xf]  ;;  %v583_v34 = vrot.slane %v581_v50, 5  ;;  %v621_v36 = vsel %vm2655_vm5, %v2728_v44, %v620_v52  ;;  %v560_v2 = vld [vmem:[%s2631_s11 + $0x14] sm:$0x1]  ;;  %s2915_s11 = scalar_lea.vmem [#allocation5], %s1835_s10 }
  0x6b   : > { %1956 = vmatpush3.bf16.msra.mxu0 %v2209_v42  ;;  %v2228_v42 = vld [vmem:[%s2993_s3 + $0x1a0] sm:$0xff]   ;;  %v636_v23 = vshrl.u32 %v2822_v54, 16  ;;  %v639_v61 = vshll.u32 %v2822_v54, 16 }
  0x6c   : > { %1984 = vmatpush3.bf16.msra.mxu1 %v2210_v43  ;;  %1997 = vmatprep.subr.bf16.mxu0 %v2213_v59  ;;  %v2229_v43 = vld [vmem:[%s2993_s3 + $0x158] sm:$0xff]   ;;  %v584_v44 = vsel %vm2643_vm4, %v2718_v41, %v583_v34 }
  0x6d   : > { %2025 = vmatprep.subr.bf16.mxu1 %v2215_v8  ;;  %v2232_v59 = vld [vmem:[%s2993_s3 + $0x1d8] sm:$0xff]   ;;  %v525_v8 = vor.u32 %v524_v0, %v520_v63  ;;  %v638_v0 = vrot.slane %v636_v23, 4  ;;  %v1851_v5 = vcombine.low %v574_v57, %v584_v44 }
  0x6e   : > { %1384 = vmatmul.mubr.bf16.vlgmr.msra.gmra.mxu0 %v1843_v13  ;;  %v516_v13 = vrot.slane %v515_v7, 4  ;;  %v2253_v34 = vld [vmem:[%s2993_s3 + $0x218] sm:$0xff]  }
  0x6f   : > { %1433 = vmatmul.mubr.bf16.vlgmr.msra.gmra.mxu1 %v1847_v24  ;;  %1998 = vmatpush3.bf16.msra.mxu0 %v2214_v16  ;;  %v526_v14 = vrot.slane %v525_v8, 4  ;;  %v552_v16 = vrot.slane %v550_v9, 4  ;;  %v624_v24 = vrot.slane %v2740_v56, 5  ;;  %v2249_v9 = vld [vmem:[%s2993_s3 + $0x230] sm:$0xff]  }
  0x70   : > { %2026 = vmatpush3.bf16.msra.mxu1 %v2216_v19  ;;  %1999 = vmatprep.subr.bf16.mxu0 %v2217_v22  ;;  %v521_v19 = vsel %vm2643_vm4, %v516_v13, %v520_v63  ;;  %v2237_v22 = vld [vmem:[%s2993_s3 + $0x1d0] sm:$0xff]  }
  0x71   : > { %2027 = vmatprep.subr.bf16.mxu1 %v2219_v25  ;;  %1440 = vmatprep.mubr.bf16.mxu1 %v1850_v3  ;;  %v531_v20 = vsel %vm2643_vm4, %v526_v14, %v530_v1  ;;  %v554_v21 = vsel %vm2655_vm5, %v552_v16, %v553_v10  ;;  %v625_v3 = vsel %vm2655_vm5, %v1840_v30, %v624_v24  ;;  %v627_v10 = vrot.slane %v560_v2, 5 }
  0x72   : > { %v1846_v25 = vcombine.low %v521_v19, %v531_v20  ;;  %v1848_v26 = vcombine.low %v551_v15, %v554_v21  ;;  %v2861_v19 = vld [vmem:[%s2819_s8 + $0x14] sm:$0x1] }
  0x73   : > { %2000 = vmatpush3.bf16.msra.mxu0 %v2218_v27  ;;  %v2238_v27 = vld [vmem:[%s2993_s3 + $0x190] sm:$0xff]  }
  0x74   : > { %2028 = vmatpush3.bf16.msra.mxu1 %v2220_v28  ;;  %2001 = vmatprep.subr.bf16.mxu0 %v2221_v29  ;;  %v588_v28 = vrot.slane %v586_v58, 4  ;;  %v2239_v29 = vld [vmem:[%s2993_s3 + $0x148] sm:$0xff]  }
  0x75   : > { %2029 = vmatprep.subr.bf16.mxu1 %v2223_v31  ;;  %1391 = vmatprep.mubr.bf16.mxu0 %v1846_v25  ;;  %v2240_v31 = vld [vmem:[%s2993_s3 + $0x108] sm:$0xff]  }
  0x76   : > { %1392 = vmatmul.mubr.bf16.gmra.mxu0 %v1844_v18  ;;  %v2831_v58 = vld [vmem:[%s2819_s8 + $0x8] sm:$0x1]  ;;  %v2858_v18 = vld [vmem:[%s2819_s8 + $0x10] sm:$0xf] }
  0x77   : > { %2002 = vmatpush3.bf16.msra.mxu0 %v2222_v33  ;;  %1441 = vmatmul.mubr.bf16.gmra.mxu1 %v1848_v26  ;;  %v2241_v33 = vld [vmem:[%s2993_s3 + $0x1c8] sm:$0xff]   ;;  %v655_v1 = vshll.u32 %v2831_v58, 16  ;;  %v698_v60 = vrot.slane %v2858_v18, 5 }
  0x78   : > { %2030 = vmatpush3.bf16.msra.mxu1 %v2224_v35  ;;  %2003 = vmatprep.subr.bf16.mxu0 %v2225_v37  ;;  %v595_v35 = vshll.u32 %v2740_v56, 16  ;;  %v2242_v37 = vld [vmem:[%s2993_s3 + $0x188] sm:$0xff]   ;;  %v2828_v56 = vld [vmem:[%s2819_s8 + $0x4] sm:$0xf] }
  0x79   : > { %2031 = vmatprep.subr.bf16.mxu1 %v2227_v40  ;;  %v592_v40 = vor.u32 %v591_v32, %v588_v28  ;;  %v645_v62 = vshll.u32 %v2828_v56, 16  ;;  %v649_v63 = vshrl.u32 %v2828_v56, 16  ;;  %v657_v41 = vrot.slane %v655_v1, 5  ;;  %v2250_v28 = vld [vmem:[%s2993_s3 + $0x228] sm:$0xff]   ;;  %v2256_v1 = vld [vmem:[%s2993_s3 + $0x200] sm:$0xff]  }
  0x7a   : > { %v2794_v46 = vrot.slane %v595_v35, 5  ;;  %v1855_v15 = vcombine.low %v2822_v54, %v2828_v56  ;;  %v691_v52 = vrot.slane %v2828_v56, 5 }
  0x7b   : > { %2004 = vmatpush3.bf16.msra.mxu0 %v2226_v39  ;;  %v626_v39 = vrot.slane %v624_v24, 4  ;;  %v2800_v49 = vrot.slane %v592_v40, 4  ;;  %v647_v7 = vrot.slane %v645_v62, 5  ;;  %v651_v8 = vrot.slane %v649_v63, 4  ;;  %v2255_v62 = vld [vmem:[%s2993_s3 + $0x208] sm:$0xff]  }
  0x7c   : > { %2032 = vmatpush3.bf16.msra.mxu1 %v2228_v42  ;;  %2005 = vmatprep.subr.bf16.mxu0 %v2229_v43  ;;  %v2243_v42 = vld [vmem:[%s2993_s3 + $0x140] sm:$0xff]   ;;  %v601_v43 = vrot.slane %v599_v11, 4  ;;  %v701_v63 = vrot.slane %v2861_v19, 5 }
  0x7d   : > { %2033 = vmatprep.subr.bf16.mxu1 %v2232_v59  ;;  %v1853_v59 = vcombine.low %v618_v51, %v621_v36  ;;  %v652_v14 = vor.u32 %v651_v8, %v647_v7  ;;  %v598_v16 = vsel %vm2643_vm4, %v2800_v49, %v2794_v46  ;;  %v628_v20 = vsel %vm2655_vm5, %v626_v39, %v627_v10 }
  0x7e   : > { %v602_v38 = vor.u32 %v601_v43, %v2794_v46  ;;  %v679_v46 = vshll.u32 %v2861_v19, 16  ;;  %v1841_v51 = vrot.slane %v2822_v54, 9  ;;  %v693_v54 = vrot.slane %v691_v52, 4 }
  0x7f   : > { %2006 = vmatpush3.bf16.msra.mxu0 %v2230_v53  ;;  %v2246_v53 = vld [vmem:[%s2993_s3 + $0x180] sm:$0xff]   ;;  %1481 = vmatprep.mubr.bf16.mxu0 %v1853_v59  ;;  %v653_v26 = vrot.slane %v652_v14, 4 }
  0x80   : > { %2034 = vmatpush3.bf16.msra.mxu1 %v2234_v6  ;;  %2007 = vmatprep.subr.bf16.mxu0 %v2235_v12  ;;  %v641_v6 = vrot.slane %v639_v61, 5  ;;  %v603_v11 = vrot.slane %v602_v38, 4  ;;  %v605_v12 = vshll.u32 %v560_v2, 16  ;;  %v681_v50 = vrot.slane %v679_v46, 5  ;;  %v2254_v61 = vld [vmem:[%s2993_s3 + $0x210] sm:$0xff]  }
  0x81   : > { %2035 = vmatprep.subr.bf16.mxu1 %v2237_v22  ;;  %v692_v36 = vsel %vm2655_vm5, %v1841_v51, %v691_v52 }
  0x82   : > { %v642_v13 = vor.u32 %v641_v6, %v638_v0  ;;  %v607_v21 = vrot.slane %v605_v12, 5  ;;  %v700_v0 = vrot.slane %v698_v60, 4 }
  0x83   : > { %2008 = vmatpush3.bf16.msra.mxu0 %v2236_v17  ;;  %v2855_v17 = vld [vmem:[%s2819_s8 + $0xc] sm:$0xf] }
  0x84   : > { %2036 = vmatpush3.bf16.msra.mxu1 %v2238_v27  ;;  %2009 = vmatprep.subr.bf16.mxu0 %v2239_v29  ;;  %v660_v22 = vshrl.u32 %v2855_v17, 16  ;;  %v663_v24 = vshll.u32 %v2855_v17, 16  ;;  %v643_v25 = vrot.slane %v642_v13, 4  ;;  %v1854_v27 = vcombine.low %v625_v3, %v628_v20 }
  0x85   : > { %2037 = vmatprep.subr.bf16.mxu1 %v2241_v33  ;;  %v669_v29 = vshll.u32 %v2858_v18, 16  ;;  %v608_v30 = vsel %vm2643_vm4, %v603_v11, %v607_v21  ;;  %v673_v33 = vshrl.u32 %v2858_v18, 16  ;;  %v1842_v44 = vrot.slane %v2855_v17, 9 }
  0x86   : > { %v665_v32 = vrot.slane %v663_v24, 5  ;;  %v648_v35 = vsel %vm2643_vm4, %v643_v25, %v647_v7  ;;  %v1852_v39 = vcombine.low %v598_v16, %v608_v30  ;;  %v702_v3 = vsel %vm2655_vm5, %v700_v0, %v701_v63 }
  0x87   : > { %2010 = vmatpush3.bf16.msra.mxu0 %v2240_v31  ;;  %v662_v31 = vrot.slane %v660_v22, 4  ;;  %v671_v40 = vrot.slane %v669_v29, 5  ;;  %v699_v2 = vsel %vm2655_vm5, %v1842_v44, %v698_v60 }
  0x88   : > { %2038 = vmatpush3.bf16.msra.mxu1 %v2242_v37  ;;  %2011 = vmatprep.subr.bf16.mxu0 %v2243_v42  ;;  %v658_v37 = vsel %vm2643_vm4, %v653_v26, %v657_v41 }
  0x89   : > { %2039 = vmatprep.subr.bf16.mxu1 %v2245_v47  ;;  %v1857_v42 = vcombine.low %v648_v35, %v658_v37  ;;  %v666_v43 = vor.u32 %v665_v32, %v662_v31  ;;  %v2252_v47 = vld [vmem:[%s2993_s3 + $0x220] sm:$0xff]  }
  0x8b   : > { %2012 = vmatpush3.bf16.msra.mxu0 %v2244_v45  ;;  %v675_v45 = vrot.slane %v673_v33, 4  ;;  %1530 = vmatprep.mubr.bf16.mxu1 %v1857_v42  ;;  %v667_v48 = vrot.slane %v666_v43, 4 }
  0x8c   : > { %2063 = vmatprep.subr.bf16.mxu0 %v2247_v55  ;;  %2040 = vmatpush3.bf16.msra.mxu1 %v2246_v53  ;;  %v694_v53 = vrot.slane %v2831_v58, 5  ;;  %v1856_v58 = vcombine.low %v2855_v17, %v2858_v18 }
  0x8d   : > { %v676_v49 = vor.u32 %v675_v45, %v671_v40 }
  0x8e   : > { %1482 = vmatmul.mubr.bf16.vlgmr.msra.gmra.mxu0 %v1851_v5  ;;  %v695_v38 = vsel %vm2655_vm5, %v693_v54, %v694_v53  ;;  %v1860_v5 = vcombine.low %v699_v2, %v702_v3 }
  0x8f   : > { %2064 = vmatpush3.bf16.msra.mxu0 %v2247_v55  ;;  %1489 = vmatprep.mubr.bf16.mxu0 %v1854_v27  ;;  %v672_v55 = vsel %vm2643_vm4, %v667_v48, %v671_v40  ;;  %v677_v57 = vrot.slane %v676_v49, 4  ;;  %v1859_v59 = vcombine.low %v692_v36, %v695_v38 }
  0x90   : > { %2065 = vmatprep.subr.bf16.mxu0 %v2249_v9  ;;  %1531 = vmatmul.mubr.bf16.vlgmr.msra.gmra.mxu1 %v1855_v15 }
  0x91   : > { %v682_v23 = vsel %vm2643_vm4, %v677_v57, %v681_v50 }
  0x92   : > { %v1858_v56 = vcombine.low %v672_v55, %v682_v23 }
  0x93   : > { %2066 = vmatpush3.bf16.msra.mxu0 %v2249_v9 }
  0x94   : > { %2067 = vmatprep.subr.bf16.mxu0 %v2250_v28  ;;  %1538 = vmatprep.mubr.bf16.mxu1 %v1858_v56 }
  0x96   : > { %1490 = vmatmul.mubr.bf16.gmra.mxu0 %v1852_v39 }
  0x97   : > { %2068 = vmatpush3.bf16.msra.mxu0 %v2250_v28  ;;  %2079 = vmatprep.mubr.bf16.mxu0 %v1859_v59 }
  0x98   : > { %2069 = vmatprep.subr.bf16.mxu0 %v2252_v47  ;;  %1539 = vmatmul.mubr.bf16.gmra.mxu1 %v1856_v58 }
  0x9b   : > { %2070 = vmatpush3.bf16.msra.mxu0 %v2252_v47 }
  0x9c   : > { %2071 = vmatprep.subr.bf16.mxu0 %v2253_v34 }
  0x9f   : > { %2072 = vmatpush3.bf16.msra.mxu0 %v2253_v34 }
  0xa0   : > { %2073 = vmatprep.subr.bf16.mxu0 %v2254_v61 }
  0xa3   : > { %2074 = vmatpush3.bf16.msra.mxu0 %v2254_v61 }
  0xa4   : > { %2075 = vmatprep.subr.bf16.mxu0 %v2255_v62 }
  0xa7   : > { %2076 = vmatpush3.bf16.msra.mxu0 %v2255_v62 }
  0xa8   : > { %2077 = vmatprep.subr.bf16.mxu0 %v2256_v1 }
  0xab   : > { %2078 = vmatpush3.bf16.msra.mxu0 %v2256_v1 }
  0xae   : > { %2080 = vmatmul.mubr.bf16.vlgmr.msra.gmra.mxu0 %v1860_v5 }
 0x12e   : > { %v1957_v6 = vpop.f32.mrf.mxu0 }
 0x12f   : > { %v1985_v8 = vpop.f32.mrf.mxu1 }
 0x130   : > { %v1958_v7 = vpop.f32.mrf.mxu0 }
 0x131   : > { %v1986_v41 = vpop.f32.mrf.mxu1  ;;  %v1959_v39 = vadd.f32 %v1958_v7, %v1957_v6 }
 0x132   : > { %v1960_v9 = vpop.f32.mrf.mxu0  ;;  %v1987_v40 = vadd.f32 %v1986_v41, %v1985_v8 }
 0x133   : > { %v1988_v11 = vpop.f32.mrf.mxu1 }
 0x134   : > { %v1961_v10 = vpop.f32.mrf.mxu0  ;;  %v1435_v50 = vadd.f32 %v1987_v40, %v1959_v39 }
 0x135   : > { %v1989_v14 = vpop.f32.mrf.mxu1  ;;  %v1962_v51 = vadd.f32 %v1961_v10, %v1960_v9 }
 0x136   : > { %v1963_v12 = vpop.f32.mrf.mxu0  ;;  %v1990_v52 = vadd.f32 %v1989_v14, %v1988_v11 }
 0x137   : > { %v1991_v15 = vpop.f32.mrf.mxu1 }
 0x138   : > { %v1964_v13 = vpop.f32.mrf.mxu0  ;;  %v1438_v58 = vadd.f32 %v1990_v52, %v1962_v51 }
 0x139   : > { %v1992_v17 = vpop.f32.mrf.mxu1  ;;  %v1965_v35 = vadd.f32 %v1964_v13, %v1963_v12 }
 0x13a   : > { %v1966_v16 = vpop.f32.mrf.mxu0  ;;  %v1993_v37 = vadd.f32 %v1992_v17, %v1991_v15 }
 0x13b   : > { %v1994_v19 = vpop.f32.mrf.mxu1 }
 0x13c   : > { %v1967_v18 = vpop.f32.mrf.mxu0  ;;  %v1443_v46 = vadd.f32 %v1993_v37, %v1965_v35 }
 0x13d   : > { %v1995_v22 = vpop.f32.mrf.mxu1  ;;  %v1968_v47 = vadd.f32 %v1967_v18, %v1966_v16 }
 0x13e   : > { %v1996_v48 = vadd.f32 %v1995_v22, %v1994_v19 }
 0x140   : > { %v1446_v36 = vadd.f32 %v1996_v48, %v1968_v47 }
 0x14e   : > { %v2013_v4 = vpop.f32.mrf.mxu0 }
 0x150   : > { %v2014_v20 = vpop.f32.mrf.mxu0  ;;  %v2041_v24 = vpop.f32.mrf.mxu1 }
 0x151   : > { %v2015_v49 = vadd.f32 %v2014_v20, %v2013_v4 }
 0x152   : > { %v2016_v21 = vpop.f32.mrf.mxu0  ;;  %v2042_v26 = vpop.f32.mrf.mxu1 }
 0x153   : > { %v1484_v54 = vadd.f32 %v2015_v49, %v1435_v50  ;;  %v2043_v23 = vadd.f32 %v2042_v26, %v2041_v24 }
 0x154   : > { %v2017_v25 = vpop.f32.mrf.mxu0  ;;  %v2044_v27 = vpop.f32.mrf.mxu1 }
 0x155   : > { %v2018_v56 = vadd.f32 %v2017_v25, %v2016_v21  ;;  %v1533_v0 = vadd.f32 %v2043_v23, %v1484_v54 }
 0x156   : > { %v2019_v28 = vpop.f32.mrf.mxu0  ;;  %v2045_v29 = vpop.f32.mrf.mxu1 }
 0x157   : > { %v1487_v62 = vadd.f32 %v2018_v56, %v1438_v58  ;;  %v2046_v63 = vadd.f32 %v2045_v29, %v2044_v27 }
 0x158   : > { %v2020_v30 = vpop.f32.mrf.mxu0  ;;  %v2047_v31 = vpop.f32.mrf.mxu1 }
 0x159   : > { %v2021_v42 = vadd.f32 %v2020_v30, %v2019_v28  ;;  %v1536_v7 = vadd.f32 %v2046_v63, %v1487_v62 }
 0x15a   : > { %v2022_v32 = vpop.f32.mrf.mxu0  ;;  %v2048_v33 = vpop.f32.mrf.mxu1 }
 0x15b   : > { %v1492_v53 = vadd.f32 %v2021_v42, %v1443_v46  ;;  %v2049_v55 = vadd.f32 %v2048_v33, %v2047_v31 }
 0x15c   : > { %v2023_v43 = vpop.f32.mrf.mxu0  ;;  %v2050_v45 = vpop.f32.mrf.mxu1 }
 0x15d   : > { %v2024_v57 = vadd.f32 %v2023_v43, %v2022_v32  ;;  %v1541_v61 = vadd.f32 %v2049_v55, %v1492_v53 }
 0x15e   : > { %v2051_v34 = vpop.f32.mrf.mxu1 }
 0x15f   : > { %v1495_v38 = vadd.f32 %v2024_v57, %v1446_v36  ;;  %v2052_v59 = vadd.f32 %v2051_v34, %v2050_v45 }
 0x161   : > { %v1544_v3 = vadd.f32 %v2052_v59, %v1495_v38 }
 0x16e   : > { %v2081_v60 = vpop.f32.mrf.mxu0 }
 0x16f   : > { %v1590_v44 = vadd.f32 %v2081_v60, %v1541_v61 }
 0x170   : > { %v1581_v1 = vpop.f32.mrf.mxu0 }
 0x171   : > { %1598 = vst [vmem:[%s2915_s11 + $0x10] sm:$0xff] %v1590_v44  ;;  %v1582_v2 = vadd.f32 %v1581_v1, %v1533_v0  ;;  %v1611_v12 = vmul.f32 %v1590_v44, %v1590_v44 }
 0x172   : > { %v2082_v5 = vpop.f32.mrf.mxu0 }
 0x173   : > { %1596 = vst [vmem:[%s2915_s11] sm:$0xff] %v1582_v2  ;;  %v1593_v6 = vadd.f32 %v2082_v5, %v1544_v3  ;;  %v1609_v41 = vmul.f32 %v1582_v2, %v1582_v2 }
 0x174   : > { %v1584_v8 = vpop.f32.mrf.mxu0 }
 0x175   : > { %1599 = vst [vmem:[%s2915_s11 + $0x18] sm:$0xff] %v1593_v6  ;;  %v1585_v9 = vadd.f32 %v1584_v8, %v1536_v7  ;;  %v1612_v15 = vmul.f32 %v1593_v6, %v1593_v6 }
 0x177   : > { %1597 = vst [vmem:[%s2915_s11 + $0x8] sm:$0xff] %v1585_v9  ;;  %v1600_v10 = vadd.f32 %v1585_v9, %v1582_v2  ;;  %v1610_v11 = vmul.f32 %v1585_v9, %v1585_v9 }
 0x179   : > { %v1601_v13 = vadd.f32 %v1600_v10, %v1590_v44  ;;  %v1613_v14 = vadd.f32 %v1610_v11, %v1609_v41 }
 0x17b   : > { %v1602_v16 = vadd.f32 %v1601_v13, %v1593_v6  ;;  %v1614_v17 = vadd.f32 %v1613_v14, %v1611_v12 }
 0x17d   : > { %v1603_v18 = vrot.slane %v1602_v16, 4  ;;  %v1615_v4 = vadd.f32 %v1614_v17, %v1612_v15 }
 0x17f   : > { %v1604_v19 = vadd.f32 %v1603_v18, %v1602_v16  ;;  %v1616_v20 = vrot.slane %v1615_v4, 4 }
 0x181   : > { %v1605_v21 = vrot.slane %v1604_v19, 2  ;;  %v1617_v22 = vadd.f32 %v1616_v20, %v1615_v4 }
 0x183   : > { %v1606_v24 = vadd.f32 %v1605_v21, %v1604_v19  ;;  %v1618_v25 = vrot.slane %v1617_v22, 2 }
 0x185   : > { %v1607_v26 = vrot.slane %v1606_v24, 1  ;;  %v1619_v27 = vadd.f32 %v1618_v25, %v1617_v22 }
 0x187   : > { %v1620_v28 = vrot.slane %v1619_v27, 1  ;;  %v1608_v29 = vadd.f32 %v1607_v26, %v1606_v24 }
 0x189   : > { %v1621_v30 = vadd.f32 %v1620_v28, %v1619_v27 }
 0x18b   : > { %v1623_v31 = vsel %vm1622_vm6, %v1608_v29, %v1621_v30 }
 0x18c   : > { %1624 = vst [vmem:[%s471_s16] sm:$0x3] %v1623_v31 }
 0x18d   : > { %s1940_s9 = sshll.u32 %s2434_s26, 8  ;;  %s1654_s7 = sshll.u32 %s2915_s11, 4  ;;  %s1655_s7 = int_to_ptr.vmem [resolvable:$true] %s1654_s7 }
 0x18e   : > { %s1643_s19 = scalar_lea.hbm %s2994_s4, %s1940_s9  ;;  %s2355_s8 = smov 256  }
 0x18f   : > { %2090 = sst [smem:[#allocation10]] (%p2490_p11), %s2355_s8  ;;  %s2356_s0 = smov 4096  }
 0x190   : > { %2091 = sst [smem:[#allocation10 + $0x1]] (%p2490_p11), %s2356_s0  ;;  %s2357_s10 = smov 2  }
 0x191   : > { %2092 = sst [smem:[#allocation10 + $0x2]] (%p2490_p11), %s2357_s10  ;;  %s2358_s15 = smov 128  }
 0x192   : > { %2093 = sst [smem:[#allocation10 + $0x3]] (%p2490_p11), %s2358_s15  ;;  %s2359_s11 = smov 8  }
 0x193   : > { %2094 = sst [smem:[#allocation10 + $0x4]] (%p2490_p11), %s2358_s15  ;;  %s2360_s12 = smov 131072  }
 0x194   : > { %2095 = sst [smem:[#allocation10 + $0x5]] (%p2490_p11), %s2359_s11  ;;  %s2361_s9 = smov 0  }
 0x195   : > { %2096 = dma.general (%p2490_p11), %s1655_s7, 512, %s1643_s19, %s1626_s27, %s2360_s12, [#allocation10], %s2361_s9, 0  }
 0x196   : > { %s1937_s21 = sshll.u32 %s2434_s26, 5  ;;  %s1683_s8 = sshll.u32 %s471_s16, 4  ;;  %s1684_s8 = int_to_ptr.vmem [resolvable:$true] %s1683_s8 }
 0x197   : > { %s1681_s10 = scalar_lea.hbm %s2995_s5, %s1937_s21  ;;  %s2257_s1 = scalar_lea.vmem %s1684_s8, 32 }
 0x198   : > { %p2258_p5 = scmp.ne.s32.totalorder %s1684_s8, %s2257_s1  ;;  %s2362_s15 = smov [#allocation7]  }
 0x199   : > { %s2261_s11 = sshll.u32 %s2362_s15, 4  ;;  %s2262_s11 = int_to_ptr.vmem [resolvable:$false] %s2261_s11 }
 0x19a   : > { %p2259_p6 = pnand %p2258_p5, %p2490_p11  ;;  %s2263_s2 = scalar_lea.vmem %s2262_s11, 64 }
 0x19b   : > { %p2264_p8 = scmp.lt.s32.totalorder %s1684_s8, %s2262_s11  ;;  %p2265_p9 = scmp.lt.s32.totalorder %s2263_s2, %s2257_s1 }
 0x19c   : > { %p2260_p7 = pneg %p2259_p6 }
 0x19d   : > { %p2266_p10 = por %p2265_p9, %p2264_p8 }
 0x19f   : > { %p2267_p12 = pnand %p2266_p10, %p2260_p7 }
 0x1a1   : > { %2270 = shalt.err (!%p2267_p12)
}
 0x1a2   : > { %s2271_s26 = scalar_lea.hbm %s1681_s10, 32  ;;  %s2275_s29 = scalar_lea.hbm %s2995_s5, 512 }
 0x1a3   : > { %p2272_p13 = scmp.ne.s32.totalorder %s1681_s10, %s2271_s26  ;;  %p2276_p2 = scmp.lt.s32.totalorder %s1681_s10, %s2995_s5 }
 0x1a4   : > { %p2277_p3 = scmp.lt.s32.totalorder %s2275_s29, %s2271_s26 }
 0x1a5   : > { %p2273_p4 = pnand %p2272_p13, %p2490_p11 }
 0x1a6   : > { %p2278_p5 = por %p2277_p3, %p2276_p2 }
 0x1a7   : > { %p2274_p0 = pneg %p2273_p4 }
 0x1a9   : > { %p2279_p6 = pnand %p2278_p5, %p2274_p0 }
 0x1ab   : > { %2282 = shalt.err (!%p2279_p6)
}
 0x1ac   : > { %s3012_s1 = scalar_lea.sflag [#allocation8], %s2531_s14 }
 0x1ad   : > { %2097 = dma.vmem_to_hbm [thread:$0]  (%p2490_p11), %s1684_s8, 32, %s1681_s10, %s3012_s1  }
 0x1ae PF: > { %p2107_p7 = scmp.ge.s32.totalorder %s2353_s25, 2  ;;  %s1695_s2 = sand.u32 1, %s2325_s18  }
 0x1af   : > { %s1696_s12 = scalar_lea.sflag [#allocation6], %s1695_s2 }
 0x1b0   : > { %p2101_p8 = pnand %p2107_p7, %p2496_p1 }
 0x1b2   : > { %p2102_p9 = pneg %p2101_p8 }
 0x1b4   : > { %2316 = dma.done.wait (%p2102_p9), %s1696_s12, 512  }
 0x1b5   : > { %2318 = vsyncadd (%p2102_p9), %s1696_s12, 4294966784  ;;  %s1705_s9 = scalar_lea.sflag [#allocation8], %s1695_s2 }
 0x1b6   : > { %2320 = dma.done.wait (%p2102_p9), %s1705_s9, 32  }
 0x1b7   : > { %2322 = vsyncadd (%p2102_p9), %s1705_s9, 4294967264  ;;  %s3013_s30 = sld [smem:[#allocation13_spill]]  ;;  %p19_p11 = scmp.ge.s32.totalorder %s2438_s28, 18  }
 0x1b8   : > { %s3014_s18 = smov %s2345_s23  ;;  %s3015_s19 = smov %s2333_s20 }
 0x1b9   : > { %s3016_s20 = smov %s2479_s17  ;;  %s3017_s21 = smov %s2341_s22 }
 0x1ba   : > { %s3018_s22 = smov %s2466_s13  ;;  %s3019_s23 = smov %s2349_s24 }
 0x1bb   : > { %s3021_s25 = smov %s2438_s28  ;;  %21 = sbr.rel (!%p19_p11) target bundleno = 11 (0xb), region = 237 }
 0x1bd   : > { %s3020_s24 = smov %s3013_s30 }
 0x1c0   :  { %1710 = vsyncpa [#allocation6], 1 }
 0x1c1   :  { %1712 = vsyncpa [#allocation6 + $0x1], 1 }
 0x1c2   :  { %1713 = vsyncpa [#allocation8], 1 }
 0x1c3   :  { %1715 = vsyncpa [#allocation8 + $0x1], 1 }

</bundles_post_ra>
